<compile_context>
chip_gen: v7x
topology: tpu7x:2x2x1
jax: 0.10.0
libtpu: 0.0.40
codegen_flags: <defaults>
</compile_context>

<pallas_src>
import jax
import jax.numpy as jnp
from jax.experimental import pallas as pl
from jax.experimental.pallas import tpu as pltpu


def attention_kernel(x_ref, w_ref, b_ref, o_ref, acc_ref):
    # x_ref:  (n_tile, C, hw_tile)   -- one lane-dense slab of the activation
    # w_ref:  (C_in, C_out)          -- pre-transposed, pre-scaled by 1/(H*W)
    # b_ref:  (1, C_out)
    # o_ref:  (n_tile, C_out)
    # acc_ref:(n_tile, C_in) f32     -- running spatial sum
    hw_idx = pl.program_id(1)

    @pl.when(hw_idx == 0)
    def _init():
        acc_ref[...] = jnp.zeros_like(acc_ref)

    # Partial spatial sum for this HW tile; accumulate in f32 without
    # materializing an upcast copy of the whole x tile.
    acc_ref[...] += jnp.sum(x_ref[...], axis=-1, dtype=jnp.float32)

    @pl.when(hw_idx == pl.num_programs(1) - 1)
    def _finalize():
        # Mean scale is folded into w, zero-padding of HW contributes nothing
        # to the sum, so this is exactly sigmoid(mean(x) @ W^T + b).
        logits = jnp.dot(acc_ref[...], w_ref[...],
                         preferred_element_type=jnp.float32)
        logits = logits + b_ref[...]
        o_ref[...] = jax.nn.sigmoid(logits).astype(o_ref.dtype)


def _round_up(x, m):
    return (x + m - 1) // m * m


def _choose_hw_tile(n_tile, C, HW, itemsize, budget_bytes=4 * 1024 * 1024):
    """Largest lane tile (multiple of 128, capped at 2048) fitting the budget."""
    hw_full = _round_up(HW, 128)
    per_lane_bytes = max(1, n_tile * C * itemsize)
    max_lanes = max(128, (budget_bytes // per_lane_bytes) // 128 * 128)
    return min(hw_full, 2048, max_lanes)


def attention_forward(x, w, b):
    """x: (N, C, H, W); w: (C_out, C_in) conv weight; b: (C_out,).

    Returns sigmoid(conv1x1(adaptive_avg_pool2d(x, 1))) with shape (N, C, 1, 1).
    """
    N, C, H, W = x.shape
    HW = H * W

    # Batch tile: keep whole batch when small, 8-row tiles when divisible.
    n_tile = 8 if (N > 8 and N % 8 == 0) else N

    hw_tile = _choose_hw_tile(n_tile, C, HW, x.dtype.itemsize)
    hw_pad = _round_up(HW, hw_tile)

    x3 = x.reshape(N, C, HW)
    if hw_pad != HW:
        # Zero padding is harmless: we accumulate a sum and divide by true HW.
        x3 = jnp.pad(x3, ((0, 0), (0, 0), (0, hw_pad - HW)))

    # Pre-transpose to (C_in, C_out) and fold the 1/(H*W) mean scale in once.
    w_t = (w.T / jnp.float32(HW)).astype(jnp.float32)
    b2 = b.reshape(1, C).astype(jnp.float32)

    grid = (pl.cdiv(N, n_tile), hw_pad // hw_tile)

    out = pl.pallas_call(
        attention_kernel,
        out_shape=jax.ShapeDtypeStruct((N, C), jnp.float32),
        grid_spec=pltpu.PrefetchScalarGridSpec(
            num_scalar_prefetch=0,
            grid=grid,
            in_specs=[
                pl.BlockSpec((n_tile, C, hw_tile), lambda n, h: (n, 0, h)),
                pl.BlockSpec((C, C), lambda n, h: (0, 0)),
                pl.BlockSpec((1, C), lambda n, h: (0, 0)),
            ],
            out_specs=pl.BlockSpec((n_tile, C), lambda n, h: (n, 0)),
            scratch_shapes=[pltpu.VMEM((n_tile, C), jnp.float32)],
        ),
        compiler_params=pltpu.CompilerParams(
            dimension_semantics=("parallel", "arbitrary"),
        ),
    )(x3, w_t, b2)

    return out.reshape(N, C, 1, 1)


if __name__ == "__main__":
    key = jax.random.PRNGKey(0)
    k_x, k_w = jax.random.split(key)

    N, C, H, W = 2, 32, 16, 16  # channel=32 matches the module default

    x = jax.random.normal(k_x, (N, C, H, W), dtype=jnp.float32)

    # Conv2d weight (C_out, C_in, 1, 1) with kaiming_normal_(fan_in, relu):
    # std = sqrt(2 / fan_in), fan_in = C_in * 1 * 1.  Bias initialized to zero.
    fan_in = C * 1 * 1
    std = (2.0 / fan_in) ** 0.5
    w = jax.random.normal(k_w, (C, C), dtype=jnp.float32) * std
    b = jnp.zeros((C,), dtype=jnp.float32)

    out = attention_forward(x, w, b)
    out = jax.block_until_ready(out)

    # Reference check in plain JAX (same math).
    pooled_ref = jnp.mean(x, axis=(2, 3))
    ref = jax.nn.sigmoid(pooled_ref @ w.T + b).reshape(N, C, 1, 1)
    assert out.shape == (N, C, 1, 1)
    assert jnp.allclose(out, ref, atol=1e-5, rtol=1e-5)

    print("KERNEL_OK")
</pallas_src>

<mosaic_0001>
module attributes {stable_mosaic.version = 11 : i64} {
  func.func @attention_kernel(%arg0: i32, %arg1: i32, %arg2: memref<2x32x256xf32, #tpu.memory_space<vmem>>, %arg3: memref<32x32xf32, #tpu.memory_space<vmem>>, %arg4: memref<1x32xf32, #tpu.memory_space<vmem>>, %arg5: memref<2x32xf32, #tpu.memory_space<vmem>>, %arg6: memref<2x32xf32, #tpu.memory_space<vmem>>) attributes {dimension_semantics = [#tpu.dimension_semantics<parallel>, #tpu.dimension_semantics<arbitrary>], iteration_bounds = array<i64: 1, 1>, scalar_prefetch = 0 : i64, scratch_operands = 1 : i64, tpu.core_type = #tpu.core_type<tc>, window_params = [{transform_indices = @transform_0, window_bounds = array<i64: 2, 32, 256>}, {pipeline_mode = #tpu.pipeline_mode<synchronous>, transform_indices = @transform_1, window_bounds = array<i64: 32, 32>}, {pipeline_mode = #tpu.pipeline_mode<synchronous>, transform_indices = @transform_2, window_bounds = array<i64: 1, 32>}, {transform_indices = @transform_3, window_bounds = array<i64: 2, 32>}]} {
    %c0_i32 = arith.constant 0 : i32
    %0 = arith.cmpi eq, %arg1, %c0_i32 : i32
    %1 = arith.extui %0 : i1 to i32
    %c0_i32_0 = arith.constant 0 : i32
    %2 = arith.cmpi ne, %1, %c0_i32_0 : i32
    scf.if %2 {
      %cst_9 = arith.constant 0.000000e+00 : f32
      %11 = vector.broadcast %cst_9 : f32 to vector<2x32xf32>
      %c0_10 = arith.constant 0 : index
      %c0_11 = arith.constant 0 : index
      %12 = vector.load %arg6[%c0_10, %c0_11] : memref<2x32xf32, #tpu.memory_space<vmem>>, vector<2x32xf32>
      tpu.vector_store %arg6[%c0_10, %c0_11], %11 {strides = array<i32>} : memref<2x32xf32, #tpu.memory_space<vmem>>, vector<2x32xf32>,
    } else {
    }
    %c0 = arith.constant 0 : index
    %c0_1 = arith.constant 0 : index
    %3 = vector.load %arg6[%c0, %c0_1] : memref<2x32xf32, #tpu.memory_space<vmem>>, vector<2x32xf32>
    %c0_2 = arith.constant 0 : index
    %c0_3 = arith.constant 0 : index
    %c0_4 = arith.constant 0 : index
    %4 = vector.load %arg2[%c0_2, %c0_3, %c0_4] : memref<2x32x256xf32, #tpu.memory_space<vmem>>, vector<2x32x256xf32>
    %cst = arith.constant dense<0.000000e+00> : vector<2x32xf32>
    %5 = vector.multi_reduction <add>, %4, %cst [2] : vector<2x32x256xf32> to vector<2x32xf32>
    %6 = arith.addf %3, %5 : vector<2x32xf32>
    %c0_5 = arith.constant 0 : index
    %c0_6 = arith.constant 0 : index
    %7 = vector.load %arg6[%c0_5, %c0_6] : memref<2x32xf32, #tpu.memory_space<vmem>>, vector<2x32xf32>
    tpu.vector_store %arg6[%c0_5, %c0_6], %6 {strides = array<i32>} : memref<2x32xf32, #tpu.memory_space<vmem>>, vector<2x32xf32>,
    %c0_i32_7 = arith.constant 0 : i32
    %8 = arith.cmpi eq, %arg1, %c0_i32_7 : i32
    %9 = arith.extui %8 : i1 to i32
    %c0_i32_8 = arith.constant 0 : i32
    %10 = arith.cmpi ne, %9, %c0_i32_8 : i32
    scf.if %10 {
      %c0_9 = arith.constant 0 : index
      %c0_10 = arith.constant 0 : index
      %11 = vector.load %arg6[%c0_9, %c0_10] : memref<2x32xf32, #tpu.memory_space<vmem>>, vector<2x32xf32>
      %c0_11 = arith.constant 0 : index
      %c0_12 = arith.constant 0 : index
      %12 = vector.load %arg3[%c0_11, %c0_12] : memref<32x32xf32, #tpu.memory_space<vmem>>, vector<32x32xf32>
      %cst_13 = arith.constant dense<0.000000e+00> : vector<2x32xf32>
      %13 = tpu.matmul %11, %12, %cst_13 {dimension_numbers = #tpu.dot_dimension_numbers<[1], [0], [0], [1], [0, 0, 1, 1], [], []>} : vector<2x32xf32>, vector<32x32xf32>, vector<2x32xf32> -> vector<2x32xf32>
      %c0_14 = arith.constant 0 : index
      %c0_15 = arith.constant 0 : index
      %14 = vector.load %arg4[%c0_14, %c0_15] : memref<1x32xf32, #tpu.memory_space<vmem>>, vector<1x32xf32>
      %15 = vector.broadcast %14 : vector<1x32xf32> to vector<2x32xf32>
      %16 = arith.addf %13, %15 : vector<2x32xf32>
      %17 = arith.negf %16 : vector<2x32xf32>
      %18 = math.exp %17 : vector<2x32xf32>
      %cst_16 = arith.constant 1.000000e+00 : f32
      %19 = vector.broadcast %cst_16 : f32 to vector<2x32xf32>
      %20 = arith.addf %19, %18 : vector<2x32xf32>
      %21 = arith.divf %19, %20 : vector<2x32xf32>
      %c0_17 = arith.constant 0 : index
      %c0_18 = arith.constant 0 : index
      %22 = vector.load %arg5[%c0_17, %c0_18] : memref<2x32xf32, #tpu.memory_space<vmem>>, vector<2x32xf32>
      tpu.vector_store %arg5[%c0_17, %c0_18], %21 {strides = array<i32>} : memref<2x32xf32, #tpu.memory_space<vmem>>, vector<2x32xf32>,
    } else {
    }
    return
  }
  func.func @transform_0(%arg0: i32, %arg1: i32) -> (i32, i32, i32) {
    %c0_i32 = arith.constant 0 : i32
    %c0_i32_0 = arith.constant 0 : i32
    return %arg0, %c0_i32, %arg1 : i32, i32, i32
  }
  func.func @transform_1(%arg0: i32, %arg1: i32) -> (i32, i32) {
    %c0_i32 = arith.constant 0 : i32
    %c0_i32_0 = arith.constant 0 : i32
    %c0_i32_1 = arith.constant 0 : i32
    return %c0_i32, %c0_i32_0 : i32, i32
  }
  func.func @transform_2(%arg0: i32, %arg1: i32) -> (i32, i32) {
    %c0_i32 = arith.constant 0 : i32
    %c0_i32_0 = arith.constant 0 : i32
    %c0_i32_1 = arith.constant 0 : i32
    return %c0_i32, %c0_i32_0 : i32, i32
  }
  func.func @transform_3(%arg0: i32, %arg1: i32) -> (i32, i32) {
    %c0_i32 = arith.constant 0 : i32
    %c0_i32_0 = arith.constant 0 : i32
    return %arg0, %c0_i32 : i32, i32
  }
}

</mosaic_0001>

<bundles_post_ra>
// kernel: tpu_custom_call.1
= control target key start
LH: loop header
LB: loop body
LE: loop exit
PB: predicated region body
PF: predicated region fallthrough
CT: control target
= control target key end

     0   :  { %8 = vsyncpa [#allocation4], 0  ;;  %s445_s0 = inlined_call_operand.hbm [shape: f32[2,32,256], index: 0, kind: input, shape index: {}]   ;;  %s446_s1 = inlined_call_operand.hbm [shape: f32[32,32], index: 1, kind: input, shape index: {}]   ;;  %s447_s2 = inlined_call_operand.vmem [shape: f32[1,32], index: 2, kind: input, shape index: {}]   ;;  %s448_s3 = inlined_call_operand.hbm [shape: f32[2,32], index: 3, kind: output, shape index: {}]  }
   0x1   :  { %9 = vsyncpa [#allocation7], 0 }
   0x2   :  { %10 = vsyncpa [#allocation5], 0  ;;  %s373_s12 = smov [#allocation3]   ;;  %s301_s16 = scalar_lea.hbm %s445_s0, 2048 }
   0x3   :  { %s16_s13 = sshll.u32 %s373_s12, 4  ;;  %p302_p0 = scmp.ne.s32.totalorder %s445_s0, %s301_s16  ;;  %s17_s13 = int_to_ptr.vmem [resolvable:$true] %s16_s13 }
   0x4   :  { %p305_p1 = scmp.lt.u32.totalorder %s301_s16, %s445_s0 }
   0x6   :  { %p307_p2 = pnand %p305_p1, %p302_p0 }
   0x8   :  { %310 = shalt.err (!%p307_p2)
}
   0x9   :  { %s311_s21 = scalar_lea.vmem %s17_s13, 2048  ;;  %p316_p4 = scmp.lt.s32.totalorder %s17_s13, %s17_s13 }
   0xa   :  { %p312_p3 = scmp.ne.s32.totalorder %s17_s13, %s311_s21  ;;  %p317_p5 = scmp.lt.s32.totalorder %s311_s21, %s311_s21 }
   0xc   :  { %p318_p6 = por %p317_p5, %p316_p4 }
   0xe   :  { %p319_p7 = pnand %p318_p6, %p312_p3 }
  0x10   :  { %322 = shalt.err (!%p319_p7)
}
  0x11   :  { %s374_s22 = smov 256   ;;  %s375_s23 = smov 16  }
  0x12   :  { %22 = dma.hbm_to_vmem [thread:$0]  %s445_s0, 2048, %s17_s13, [#allocation4], %s374_s22, %s374_s22, %s375_s23  }
  0x13   :  { %s376_s26 = smov [#allocation6]   ;;  %s323_s30 = scalar_lea.hbm %s446_s1, 512 }
  0x14   :  { %s28_s27 = sshll.u32 %s376_s26, 4  ;;  %p324_p8 = scmp.ne.s32.totalorder %s446_s1, %s323_s30  ;;  %s29_s27 = int_to_ptr.vmem [resolvable:$true] %s28_s27 }
  0x15   :  { %p327_p9 = scmp.lt.u32.totalorder %s323_s30, %s446_s1 }
  0x17   :  { %p329_p10 = pnand %p327_p9, %p324_p8 }
  0x19   :  { %332 = shalt.err (!%p329_p10)
}
  0x1a   :  { %s333_s8 = scalar_lea.vmem %s29_s27, 512  ;;  %p338_p12 = scmp.lt.s32.totalorder %s29_s27, %s29_s27 }
  0x1b   :  { %p334_p11 = scmp.ne.s32.totalorder %s29_s27, %s333_s8  ;;  %p339_p13 = scmp.lt.s32.totalorder %s333_s8, %s333_s8 }
  0x1d   :  { %p340_p0 = por %p339_p13, %p338_p12 }
  0x1f   :  { %p341_p1 = pnand %p340_p0, %p334_p11 }
  0x21   :  { %344 = shalt.err (!%p341_p1)
}
  0x22   :  { %s377_s0 = smov 128   ;;  %s378_s9 = smov 8  }
  0x23   :  { %34 = dma.hbm_to_vmem [thread:$0]  %s446_s1, 512, %s29_s27, [#allocation7], %s377_s0, %s377_s0, %s378_s9  }
  0x24   :  { %367 = dma.done.wait [#allocation4], 2048  }
  0x25   :  { %368 = vsyncadd [#allocation4], 4294965248 }
  0x26   :  { %369 = dma.done.wait [#allocation7], 512  }
  0x27   :  { %370 = vsyncadd [#allocation7], 4294966784  ;;  %v58_v0 = vld [vmem:[#allocation3 + $0x40] sm:$0xff]  ;;  %v59_v1 = vld [vmem:[#allocation3 + $0x48] sm:$0xff]  ;;  %vm47_vm0 = vcmask 254976   ;;  %v379_v24 = vmov 0.0   ;;  %v98_v32 = vlaneseq }
  0x28   :  { %v50_v2 = vld [vmem:[#allocation3] sm:$0xff]  ;;  %v78_v3 = vadd.f32 %v59_v1, %v58_v0  ;;  %v51_v4 = vld [vmem:[#allocation3 + $0x8] sm:$0xff]  ;;  %v60_v5 = vld [vmem:[#allocation3 + $0x50] sm:$0xff]  ;;  %48 = vst.msk [vmem:[#allocation2] sm:$0x3] %vm47_vm0, %v379_v24  ;;  %v380_v28 = vmov 0.0|0.0  }
  0x29   :  { %v61_v6 = vld [vmem:[#allocation3 + $0x58] sm:$0xff]  ;;  %v66_v7 = vadd.f32 %v51_v4, %v50_v2  ;;  %v52_v8 = vld [vmem:[#allocation3 + $0x10] sm:$0xff]  ;;  %v62_v12 = vld [vmem:[#allocation3 + $0x60] sm:$0xff]  ;;  %281 = vmatprep.subr.bf16.mxu0 %v380_v28  ;;  %vm381_vm1 = vmmov 0   ;;  %v99_v33 = vand.u32 127, %v98_v32  ;;  %v101_v38 = vshrl.u32 %v98_v32, 7 }
  0x2a   :  { %v53_v9 = vld [vmem:[#allocation3 + $0x18] sm:$0xff]  ;;  %79 = vadd.xlane.f32.xlu1 %v78_v3  ;;  %v81_v10 = vadd.f32 %v61_v6, %v60_v5  ;;  %v63_v13 = vld [vmem:[#allocation3 + $0x68] sm:$0xff]  ;;  %v54_v14 = vld [vmem:[#allocation3 + $0x20] sm:$0xff]  ;;  %278 = vmatprep.mubr.msk.f32.mxu0 %vm381_vm1, %v379_v24  ;;  %vm109_vm2 = vcmask 130112   ;;  %vm116_vm3 = vcmask 195712   ;;  %vm123_vm4 = vcmask 261312  }
  0x2b   :  { %67 = vadd.xlane.f32.xlu0 %v66_v7  ;;  %v69_v11 = vadd.f32 %v53_v9, %v52_v8  ;;  %v55_v15 = vld [vmem:[#allocation3 + $0x28] sm:$0xff]  ;;  %v84_v16 = vadd.f32 %v63_v13, %v62_v12  ;;  %v64_v18 = vld [vmem:[#allocation3 + $0x70] sm:$0xff]  ;;  %v65_v19 = vld [vmem:[#allocation3 + $0x78] sm:$0xff]  ;;  %v104_v36 = vadd.s32 4294967288, %v99_v33  ;;  %v111_v37 = vadd.s32 4294967280, %v99_v33  ;;  %s382_s13 = smov [#allocation8]  }
  0x2c   :  { %v72_v17 = vadd.f32 %v55_v15, %v54_v14  ;;  %v56_v20 = vld [vmem:[#allocation3 + $0x30] sm:$0xff]  ;;  %v57_v21 = vld [vmem:[#allocation3 + $0x38] sm:$0xff]  ;;  %v87_v22 = vadd.f32 %v65_v19, %v64_v18  ;;  %v154_v25 = vld [vmem:[#allocation6] sm:$0xff]  ;;  %v118_v42 = vadd.s32 4294967272, %v99_v33  ;;  %v102_v44 = vsub.s32 %v99_v33, %v101_v38  ;;  %s252_s14 = sshll.u32 %s382_s13, 4  ;;  %s253_s14 = int_to_ptr.vmem [resolvable:$true] %s252_s14 }
  0x2d   :  { %v75_v23 = vadd.f32 %v57_v21, %v56_v20  ;;  %v155_v26 = vld [vmem:[#allocation6 + $0x8] sm:$0xff]  ;;  %v156_v27 = vld [vmem:[#allocation6 + $0x10] sm:$0xff]  ;;  %v157_v30 = vld [vmem:[#allocation6 + $0x18] sm:$0xff]  ;;  %v107_v40 = vsub.s32 %v104_v36, %v101_v38  ;;  %v114_v43 = vsub.s32 %v111_v37, %v101_v38  ;;  %vm144_vm5 = vcmask 1041409   ;;  %s345_s15 = scalar_lea.vmem %s253_s14, 32  ;;  %p350_p3 = scmp.lt.s32.totalorder %s253_s14, %s253_s14 }
  0x2e   :  { %82 = vadd.xlane.f32.xlu1 %v81_v10  ;;  %v282_v29 = vpack.c.bf16 %v155_v26, %v154_v25  ;;  %v285_v31 = vpack.c.bf16 %v157_v30, %v156_v27  ;;  %v121_v48 = vsub.s32 %v118_v42, %v101_v38  ;;  %vm165_vm6 = vcmask 261120   ;;  %v262_v4 = vld [vmem:[%s447_s2] ss:$0 sm:$0xff]  ;;  %p346_p2 = scmp.ne.s32.totalorder %s253_s14, %s345_s15  ;;  %p351_p4 = scmp.lt.s32.totalorder %s345_s15, %s345_s15 }
  0x2f   :  { %70 = vadd.xlane.f32.xlu0 %v69_v11  ;;  %v49_v63 = vld [vmem:[#allocation2] sm:$0x3] }
  0x30   :  { %283 = vmatpush3.bf16.msra.mxu0 %v282_v29  ;;  %p352_p5 = por %p351_p4, %p350_p3 }
  0x31   :  { %284 = vmatprep.subr.bf16.mxu0 %v380_v28 }
  0x32   :  { %85 = vadd.xlane.f32.xlu1 %v84_v16  ;;  %p353_p6 = pnand %p352_p5, %p346_p2 }
  0x33   :  { %73 = vadd.xlane.f32.xlu0 %v72_v17 }
  0x34   :  { %286 = vmatpush3.bf16.msra.mxu0 %v285_v31 }
  0x36   :  { %88 = vadd.xlane.f32.xlu1 %v87_v22 }
  0x37   :  { %76 = vadd.xlane.f32.xlu0 %v75_v23 }
  0xb7   :  { %v80_v34 = vpop.xlane.xlu1 %79 }
  0xb8   :  { %v68_v35 = vpop.xlane.xlu0 %67  ;;  %v128_v51 = vrot.slane %v80_v34, %v102_v44 }
  0xb9   :  { %v103_v53 = vrot.slane %v68_v35, %v102_v44 }
  0xbb   :  { %v83_v39 = vpop.xlane.xlu1 %82 }
  0xbc   :  { %v71_v41 = vpop.xlane.xlu0 %70  ;;  %v132_v46 = vrot.slane %v83_v39, %v107_v40 }
  0xbd   :  { %v108_v49 = vrot.slane %v71_v41, %v107_v40 }
  0xbe   :  { %v133_v55 = vsel %vm109_vm2, %v132_v46, %v128_v51 }
  0xbf   :  { %v86_v45 = vpop.xlane.xlu1 %85  ;;  %v110_v58 = vsel %vm109_vm2, %v108_v49, %v103_v53 }
  0xc0   :  { %v74_v47 = vpop.xlane.xlu0 %73  ;;  %v137_v50 = vrot.slane %v86_v45, %v114_v43 }
  0xc1   :  { %v115_v52 = vrot.slane %v74_v47, %v114_v43 }
  0xc2   :  { %v138_v59 = vsel %vm116_vm3, %v137_v50, %v133_v55 }
  0xc3   :  { %v89_v54 = vpop.xlane.xlu1 %88  ;;  %v117_v61 = vsel %vm116_vm3, %v115_v52, %v110_v58 }
  0xc4   :  { %v142_v56 = vrot.slane %v89_v54, %v121_v48  ;;  %v77_v57 = vpop.xlane.xlu0 %76 }
  0xc5   :  { %v122_v60 = vrot.slane %v77_v57, %v121_v48 }
  0xc6   :  { %v143_v62 = vsel %vm123_vm4, %v142_v56, %v138_v59 }
  0xc7   :  { %v124_v0 = vsel %vm123_vm4, %v122_v60, %v117_v61 }
  0xc8   :  { %v145_v1 = vsel %vm144_vm5, %v143_v62, %v124_v0 }
  0xc9   :  { %v147_v2 = vadd.f32 %v145_v1, %v49_v63 }
  0xcb   :  { %149 = vst.msk [vmem:[#allocation2] sm:$0x3] %vm47_vm0, %v147_v2 }
  0xd2   :  { %v153_v3 = vld [vmem:[#allocation2] sm:$0x3] }
  0xd3   :  { %279 = vmatmul.mubr.msk.f32.vlgmr.msra.gmra.mrb[0].mxu0 %vm165_vm6, %v153_v3 }
 0x1a6   :  { %v235_v5 = vpop.f32.mrb[0].mxu0 }
 0x1a7   :  { %v236_v6 = vadd.f32 %v262_v4, %v235_v5  ;;  %v280_v7 = vpop.f32.mrb[1].mxu0 }
 0x1a9   :  { %v264_v8 = vmul.f32 -1.442695, %v236_v6 }
 0x1ab   :  { %297 = vpow2.f32 %v264_v8 }
 0x1b5   :  { %v298_v9 = vpop.eup %297 }
 0x1b6   :  { %v242_v10 = vadd.f32 1.0, %v298_v9 }
 0x1b8   :  { %299 = vrcp.f32 %v242_v10 }
 0x1c2   :  { %v300_v11 = vpop.eup %299 }
 0x1c3   :  { %245 = vst.msk [vmem:[#allocation8] sm:$0x3] %vm47_vm0, %v300_v11 }
 0x1c4   :  { %356 = shalt.err (!%p353_p6)
}
 0x1c5   :  { %s357_s17 = scalar_lea.hbm %s448_s3, 32 }
 0x1c6   :  { %p358_p7 = scmp.ne.s32.totalorder %s448_s3, %s357_s17  ;;  %p361_p8 = scmp.lt.u32.totalorder %s357_s17, %s448_s3 }
 0x1c8   :  { %p363_p9 = pnand %p361_p8, %p358_p7 }
 0x1ca   :  { %366 = shalt.err (!%p363_p9)
}
 0x1cb   :  { %255 = dma.vmem_to_hbm [thread:$0]  %s253_s14, 32, %s448_s3, [#allocation5]  }
 0x1cc   :  { %371 = dma.done.wait [#allocation5], 32  }
 0x1cd   :  { %372 = vsyncadd [#allocation5], 4294967264 }
 0x1ce   :  { %259 = vsyncpa [#allocation4], 1 }
 0x1cf   :  { %260 = vsyncpa [#allocation7], 1 }
 0x1d0   :  { %261 = vsyncpa [#allocation5], 1 }

</bundles_post_ra>
